<compile_context>
chip_gen: v6e
topology: v6e:2x2x1
jax: 0.10.0
libtpu: 0.0.40
codegen_flags: <defaults>
</compile_context>

<pallas_src>
import functools

import jax
import jax.numpy as jnp
from jax.experimental import pallas as pl
from jax.experimental.pallas import tpu as pltpu

K1_MAX_TILE = 8192      # pixels/step for the fused CE kernel (lane axis), multiple of 128
K2_MAX_TILE = 131072    # pixels/step for the slow-path masked-mean kernel
_STAT_LANES = 128       # one lane-dense (1,128) partial-stats row per grid step


def _pick_k1_tile(hw, C):
    # Largest 128-aligned pixel tile whose (double-buffered logits + elementwise
    # intermediates) working set stays well under ~24 MiB of VMEM on every generation.
    budget = 24 << 20
    t = budget // (4 * (12 * C + 16))
    t = max(512, min(K1_MAX_TILE, (t // 128) * 128))
    return hw if hw <= t else t


def _pick_k2_tile(hw):
    return hw if hw <= K2_MAX_TILE else K2_MAX_TILE


def _k1_vmem_bytes(C, TL):
    need = 4 * TL * (12 * C + 16) + (2 << 20)
    return int(min(32 << 20, max(16 << 20, need)))


def _k2_vmem_bytes(TL):
    need = 4 * TL * 10 + (2 << 20)
    return int(min(32 << 20, max(16 << 20, need)))


# --------------------------------------------------------------------------
# Kernel 1: fused per-pixel CE loss + softmax prob at target + per-block stats
#   logits block: (1, C, TL)  -> channels on sublanes, pixels on lanes
#   target block: (1, 1, TL)
# --------------------------------------------------------------------------
def _ce_math(logits_ref, tgt_ref, ignore_label, hw, tile):
    logits = logits_ref[0].astype(jnp.float32)                  # (C, TL) — bf16 inputs OK
    tgt = tgt_ref[0]                                            # (1, TL) int32

    # explicit ragged-tail mask: OOB lanes of the last tile carry garbage and MUST NOT
    # contribute to the per-block partial statistics.
    p = pl.program_id(1)
    pix = p * tile + jax.lax.broadcasted_iota(jnp.int32, tgt.shape, 1)
    valid = (tgt != ignore_label) & (pix < hw)                  # (1, TL) bool
    tmp_tgt = jnp.where(valid, tgt, 0)                          # clamp ignored -> class 0

    # numerically stable log-softmax over the (small) channel/sublane axis
    m = jnp.max(logits, axis=0, keepdims=True)                  # (1, TL)
    z = logits - m                                              # (C, TL)
    lse = jnp.log(jnp.sum(jnp.exp(z), axis=0, keepdims=True))   # (1, TL)

    # gather target-class shifted logit via per-channel select (C small: keep off the MXU)
    cls = jax.lax.broadcasted_iota(jnp.int32, z.shape, 0)       # (C, TL)
    zt = jnp.sum(jnp.where(cls == tmp_tgt, z, 0.0), axis=0, keepdims=True)

    loss = jnp.where(valid, lse - zt, 0.0)                      # ignored/OOB -> 0 loss
    pred = jnp.where(valid, jnp.exp(zt - lse), jnp.inf)         # ignored/OOB -> +inf
    return loss, pred, valid


def _ce_loss_kernel(logits_ref, tgt_ref, loss_ref, *, ignore_label, hw, tile):
    loss, _, _ = _ce_math(logits_ref, tgt_ref, ignore_label, hw, tile)
    loss_ref[0] = loss


def _ce_loss_pred_stats_kernel(logits_ref, tgt_ref, loss_ref, pred_ref, stats_ref, *,
                               ignore_label, thresh, hw, tile):
    loss, pred, valid = _ce_math(logits_ref, tgt_ref, ignore_label, hw, tile)
    loss_ref[0] = loss
    pred_ref[0] = pred

    # fused per-block partial statistics (pred == +inf for ignored/OOB -> never counted)
    n_valid = jnp.sum(valid.astype(jnp.float32))
    n_le = jnp.sum(jnp.where(pred <= thresh, 1.0, 0.0))
    n_keep = jnp.sum(jnp.where(pred < thresh, 1.0, 0.0))
    s_keep = jnp.sum(jnp.where(pred < thresh, loss, 0.0))

    lane = jax.lax.broadcasted_iota(jnp.int32, (1, _STAT_LANES), 1)
    stats_ref[...] = (jnp.where(lane == 0, n_valid, 0.0)
                      + jnp.where(lane == 1, n_le, 0.0)
                      + jnp.where(lane == 2, n_keep, 0.0)
                      + jnp.where(lane == 3, s_keep, 0.0))


def _ce_softmax_call(score, target, ignore_label, thresh, want_pred):
    """score: (N,C,H,W), target: (N,H,W) -> loss (N,1,HW) [, pred (N,1,HW), stats (1,G*128)]."""
    N, C, H, W = score.shape
    hw = H * W
    logits = score.reshape(N, C, hw)                            # free reshape, no transpose
    tgt = target.reshape(N, 1, hw).astype(jnp.int32)

    TL = _pick_k1_tile(hw, C)
    n_pb = pl.cdiv(hw, TL)
    G = N * n_pb

    in_specs = [
        pl.BlockSpec((1, C, TL), lambda n, p: (n, 0, p)),
        pl.BlockSpec((1, 1, TL), lambda n, p: (n, 0, p)),
    ]
    map_block = pl.BlockSpec((1, 1, TL), lambda n, p: (n, 0, p))
    compiler_params = pltpu.CompilerParams(
        dimension_semantics=("parallel", "parallel"),
        vmem_limit_bytes=_k1_vmem_bytes(C, TL))

    if want_pred:
        kernel = functools.partial(_ce_loss_pred_stats_kernel, ignore_label=ignore_label,
                                   thresh=float(thresh), hw=hw, tile=TL)
        out_shape = (jax.ShapeDtypeStruct((N, 1, hw), jnp.float32),
                     jax.ShapeDtypeStruct((N, 1, hw), jnp.float32),   # pred kept f32 (exact OHEM cutoffs)
                     jax.ShapeDtypeStruct((1, G * _STAT_LANES), jnp.float32))
        out_specs = [map_block, map_block,
                     pl.BlockSpec((1, _STAT_LANES), lambda n, p: (0, n * n_pb + p))]
    else:
        kernel = functools.partial(_ce_loss_kernel, ignore_label=ignore_label, hw=hw, tile=TL)
        out_shape = jax.ShapeDtypeStruct((N, 1, hw), jnp.float32)
        out_specs = map_block

    return pl.pallas_call(
        kernel,
        out_shape=out_shape,
        grid_spec=pltpu.PrefetchScalarGridSpec(
            num_scalar_prefetch=0,
            grid=(N, n_pb),
            in_specs=in_specs,
            out_specs=out_specs,
        ),
        compiler_params=compiler_params,
    )(logits, tgt)


# --------------------------------------------------------------------------
# Kernel 2 (slow path only): masked mean with a data-dependent threshold.
# Lane-dense per-block partial (sum, count); fully parallel grid; huge tiles.
# --------------------------------------------------------------------------
def _ohem_partial_kernel(thr_ref, loss_ref, pred_ref, sum_ref, cnt_ref, *, hw, tile):
    thr = thr_ref[0]                                            # scalar from SMEM
    loss = loss_ref[0]                                          # (1, TL)
    pred = pred_ref[0]                                          # (1, TL)

    p = pl.program_id(1)
    pix = p * tile + jax.lax.broadcasted_iota(jnp.int32, pred.shape, 1)
    keep = (pred < thr) & (pix < hw)                            # ragged tail masked here

    block_sum = jnp.sum(jnp.where(keep, loss, 0.0))             # where(), not *: OOB loss may be NaN
    block_cnt = jnp.sum(jnp.where(keep, 1.0, 0.0))

    lane0 = jax.lax.broadcasted_iota(jnp.int32, (1, _STAT_LANES), 1) == 0
    sum_ref[...] = jnp.where(lane0, block_sum, 0.0)
    cnt_ref[...] = jnp.where(lane0, block_cnt, 0.0)


def _ohem_masked_mean(loss_map, pred_map, threshold):
    N, _, hw = loss_map.shape
    TL = _pick_k2_tile(hw)
    n_pb = pl.cdiv(hw, TL)
    G = N * n_pb

    thr = jnp.asarray(threshold, jnp.float32).reshape(1)
    kernel = functools.partial(_ohem_partial_kernel, hw=hw, tile=TL)
    map_in = lambda n, p: (n, 0, p)
    map_out = lambda n, p: (0, n * n_pb + p)

    s, c = pl.pallas_call(
        kernel,
        out_shape=(jax.ShapeDtypeStruct((1, G * _STAT_LANES), jnp.float32),
                   jax.ShapeDtypeStruct((1, G * _STAT_LANES), jnp.float32)),
        grid_spec=pltpu.PrefetchScalarGridSpec(
            num_scalar_prefetch=0,
            grid=(N, n_pb),
            in_specs=[
                pl.BlockSpec(memory_space=pltpu.MemorySpace.SMEM),   # threshold scalar
                pl.BlockSpec((1, 1, TL), map_in),
                pl.BlockSpec((1, 1, TL), map_in),
            ],
            out_specs=[
                pl.BlockSpec((1, _STAT_LANES), map_out),
                pl.BlockSpec((1, _STAT_LANES), map_out),
            ],
        ),
        compiler_params=pltpu.CompilerParams(
            dimension_semantics=("parallel", "parallel"),
            vmem_limit_bytes=_k2_vmem_bytes(TL)),
    )(thr, loss_map, pred_map)

    # mean of empty selection -> NaN, same as torch .mean()
    return jnp.sum(s) / jnp.sum(c)


# --------------------------------------------------------------------------
# Module replica
# --------------------------------------------------------------------------
class OhemCrossEntropy:
    def __init__(self, ignore_label=255, thres=0.7, min_kept=100000, weight=None):
        # weight=None in the reference config; per-class weights are not supported here.
        self.thresh = float(thres)
        self.min_kept = max(1, int(min_kept))
        self.ignore_label = int(ignore_label)

    # ---- per-pixel CE map (reduction='none') -------------------------------
    def _ce_forward(self, score, target):
        N, C, H, W = score.shape
        loss_map = _ce_softmax_call(score, target, self.ignore_label, self.thresh,
                                    want_pred=False)
        return loss_map.reshape(N, H, W)

    # ---- OHEM scalar loss ---------------------------------------------------
    def _ohem_forward(self, score, target):
        N, C, H, W = score.shape
        loss_map, pred_map, stats = _ce_softmax_call(score, target, self.ignore_label,
                                                     self.thresh, want_pred=True)
        stats2 = stats.reshape(-1, _STAT_LANES)
        num_valid = jnp.sum(stats2[:, 0].astype(jnp.int32))     # fused num_valid (exact int)
        le_cnt = jnp.sum(stats2[:, 1].astype(jnp.int32))        # #(valid & pred <= thresh)
        keep_cnt = jnp.sum(stats2[:, 2])                        # #(valid & pred <  thresh)
        keep_sum = jnp.sum(stats2[:, 3])                        # sum(loss | kept)

        k = jnp.minimum(jnp.int32(self.min_kept), num_valid - 1)
        # fast path: the k-th smallest valid pred <= thresh  <=>  OHEM threshold == thresh,
        # so the kept count/sum were already accumulated by kernel 1 — skip selection+kernel2.
        fast_ok = le_cnt >= k + 1

        pred_flat = pred_map.reshape(-1)                        # invalid pixels are +inf
        P = pred_flat.shape[0]
        k_sel = min(self.min_kept + 1, P)

        def _fast(_):
            # num_valid == 0 -> 0/0 = NaN (the torch reference raises here)
            return keep_sum / keep_cnt

        def _slow(_):
            # exact k-th order statistic of the valid preds; only the min_kept+1 smallest
            # are needed, so top-k of -pred instead of a full sort.
            # TODO(synk): replace this top_k with an O(P) histogram selection over pred in [0,1].
            neg_vals, _ = jax.lax.top_k(-pred_flat, k_sel)
            smallest = -neg_vals                                # ascending preds, +inf last
            idx = jnp.clip(k, 0, k_sel - 1)
            threshold = jnp.maximum(smallest[idx], jnp.float32(self.thresh))
            return _ohem_masked_mean(loss_map, pred_map, threshold)

        return jax.lax.cond(fast_ok, _fast, _slow, None)

    # ---- forward -------------------------------------------------------------
    def forward(self, score, target, name):
        loss = dict()
        if not isinstance(score, (list, tuple)):
            score = [score]
        balance_weights = [0.5, 0.5]
        sb_weights = 0.5
        if len(balance_weights) == len(score):
            funcs = [self._ce_forward] * (len(balance_weights) - 1) + [self._ohem_forward]
            return sum(w * f(x, target)
                       for w, x, f in zip(balance_weights, score, funcs))
        elif len(score) == 1:
            loss[name + 'ohem_loss'] = sb_weights * self._ohem_forward(score[0], target)
            return loss
        else:
            raise ValueError('lengths of prediction and target are not identical!')

    __call__ = forward


# --------------------------------------------------------------------------
if __name__ == "__main__":
    key = jax.random.PRNGKey(0)
    N, C, H, W = 2, 4, 16, 16
    k1, k2, k3, k4 = jax.random.split(key, 4)

    score0 = jax.random.normal(k1, (N, C, H, W), dtype=jnp.float32)
    score1 = jax.random.normal(k2, (N, C, H, W), dtype=jnp.float32)
    target = jax.random.randint(k3, (N, H, W), 0, C).astype(jnp.int32)
    # sprinkle some ignore_label pixels
    ign = jax.random.bernoulli(k4, 0.1, (N, H, W))
    target = jnp.where(ign, 255, target)

    mod = OhemCrossEntropy(ignore_label=255, thres=0.7, min_kept=100000)
    out = mod.forward([score0, score1], target, "decode_")   # (N, H, W)
    out = jax.block_until_ready(out)

    assert out.shape == (N, H, W)
    assert jnp.isfinite(out).all()
    print("KERNEL_OK")
</pallas_src>

<mosaic_0001>
module attributes {stable_mosaic.version = 11 : i64} {
  func.func @_ce_loss_kernel(%arg0: i32, %arg1: i32, %arg2: memref<1x4x256xf32, #tpu.memory_space<vmem>>, %arg3: memref<1x1x256xi32, #tpu.memory_space<vmem>>, %arg4: memref<1x1x256xf32, #tpu.memory_space<vmem>>) attributes {dimension_semantics = [#tpu.dimension_semantics<parallel>, #tpu.dimension_semantics<parallel>], iteration_bounds = array<i64: 2, 1>, scalar_prefetch = 0 : i64, scratch_operands = 0 : i64, tpu.core_type = #tpu.core_type<tc>, window_params = [{transform_indices = @transform_0, window_bounds = array<i64: 1, 4, 256>}, {transform_indices = @transform_1, window_bounds = array<i64: 1, 1, 256>}, {transform_indices = @transform_2, window_bounds = array<i64: 1, 1, 256>}]} {
    %c0 = arith.constant 0 : index
    %c0_0 = arith.constant 0 : index
    %c0_1 = arith.constant 0 : index
    %0 = vector.load %arg2[%c0, %c0_0, %c0_1] : memref<1x4x256xf32, #tpu.memory_space<vmem>>, vector<1x4x256xf32>
    %1 = vector.shape_cast %0 : vector<1x4x256xf32> to vector<4x256xf32>
    %c0_2 = arith.constant 0 : index
    %c0_3 = arith.constant 0 : index
    %c0_4 = arith.constant 0 : index
    %2 = vector.load %arg3[%c0_2, %c0_3, %c0_4] : memref<1x1x256xi32, #tpu.memory_space<vmem>>, vector<1x1x256xi32>
    %3 = vector.shape_cast %2 : vector<1x1x256xi32> to vector<1x256xi32>
    %c256_i32 = arith.constant 256 : i32
    %4 = arith.muli %arg1, %c256_i32 : i32
    %5 = tpu.iota {dimensions = array<i32: 1>} : vector<1x256xi32>
    %6 = vector.broadcast %4 : i32 to vector<1x256xi32>
    %7 = arith.addi %6, %5 : vector<1x256xi32>
    %c255_i32 = arith.constant 255 : i32
    %8 = vector.broadcast %c255_i32 : i32 to vector<1x256xi32>
    %9 = arith.cmpi ne, %3, %8 : vector<1x256xi32>
    %c256_i32_5 = arith.constant 256 : i32
    %10 = vector.broadcast %c256_i32_5 : i32 to vector<1x256xi32>
    %11 = arith.cmpi slt, %7, %10 : vector<1x256xi32>
    %12 = arith.andi %9, %11 : vector<1x256xi1>
    %c0_i32 = arith.constant 0 : i32
    %13 = vector.broadcast %c0_i32 : i32 to vector<1x256xi32>
    %14 = arith.select %12, %3, %13 : vector<1x256xi1>, vector<1x256xi32>
    %cst = arith.constant dense<0xFF800000> : vector<256xf32>
    %15 = vector.multi_reduction <maximumf>, %1, %cst [0] : vector<4x256xf32> to vector<256xf32>
    %16 = vector.shape_cast %15 : vector<256xf32> to vector<1x256xf32>
    %17 = vector.broadcast %16 : vector<1x256xf32> to vector<4x256xf32>
    %18 = arith.subf %1, %17 : vector<4x256xf32>
    %19 = math.exp %18 : vector<4x256xf32>
    %cst_6 = arith.constant dense<0.000000e+00> : vector<256xf32>
    %20 = vector.multi_reduction <add>, %19, %cst_6 [0] : vector<4x256xf32> to vector<256xf32>
    %21 = vector.shape_cast %20 : vector<256xf32> to vector<1x256xf32>
    %22 = math.log %21 : vector<1x256xf32>
    %23 = tpu.iota {dimensions = array<i32: 0>} : vector<4x256xi32>
    %24 = vector.broadcast %14 : vector<1x256xi32> to vector<4x256xi32>
    %25 = arith.cmpi eq, %23, %24 : vector<4x256xi32>
    %cst_7 = arith.constant 0.000000e+00 : f32
    %26 = vector.broadcast %cst_7 : f32 to vector<4x256xf32>
    %27 = arith.select %25, %18, %26 : vector<4x256xi1>, vector<4x256xf32>
    %cst_8 = arith.constant dense<0.000000e+00> : vector<256xf32>
    %28 = vector.multi_reduction <add>, %27, %cst_8 [0] : vector<4x256xf32> to vector<256xf32>
    %29 = vector.shape_cast %28 : vector<256xf32> to vector<1x256xf32>
    %30 = arith.subf %22, %29 : vector<1x256xf32>
    %cst_9 = arith.constant 0.000000e+00 : f32
    %31 = vector.broadcast %cst_9 : f32 to vector<1x256xf32>
    %32 = arith.select %12, %30, %31 : vector<1x256xi1>, vector<1x256xf32>
    %c0_10 = arith.constant 0 : index
    %c0_11 = arith.constant 0 : index
    %c0_12 = arith.constant 0 : index
    %33 = vector.load %arg4[%c0_10, %c0_11, %c0_12] : memref<1x1x256xf32, #tpu.memory_space<vmem>>, vector<1x1x256xf32>
    %34 = vector.shape_cast %33 : vector<1x1x256xf32> to vector<1x256xf32>
    %35 = vector.shape_cast %32 : vector<1x256xf32> to vector<1x1x256xf32>
    tpu.vector_store %arg4[%c0_10, %c0_11, %c0_12], %35 {strides = array<i32>} : memref<1x1x256xf32, #tpu.memory_space<vmem>>, vector<1x1x256xf32>,
    return
  }
  func.func @transform_0(%arg0: i32, %arg1: i32) -> (i32, i32, i32) {
    %c0_i32 = arith.constant 0 : i32
    %c0_i32_0 = arith.constant 0 : i32
    return %arg0, %c0_i32, %arg1 : i32, i32, i32
  }
  func.func @transform_1(%arg0: i32, %arg1: i32) -> (i32, i32, i32) {
    %c0_i32 = arith.constant 0 : i32
    %c0_i32_0 = arith.constant 0 : i32
    return %arg0, %c0_i32, %arg1 : i32, i32, i32
  }
  func.func @transform_2(%arg0: i32, %arg1: i32) -> (i32, i32, i32) {
    %c0_i32 = arith.constant 0 : i32
    %c0_i32_0 = arith.constant 0 : i32
    return %arg0, %c0_i32, %arg1 : i32, i32, i32
  }
}

</mosaic_0001>

<bundles_post_ra>
// kernel: tpu_custom_call.1
= control target key start
LH: loop header
LB: loop body
LE: loop exit
PB: predicated region body
PF: predicated region fallthrough
CT: control target
= control target key end

     0   :  { %7 = vsyncpa [#allocation3], 0  ;;  %s941_s0 = inlined_call_operand.hbm [shape: f32[2,4,256], index: 0, kind: input, shape index: {}]   ;;  %s942_s1 = inlined_call_operand.hbm [shape: s32[2,1,256], index: 1, kind: input, shape index: {}]   ;;  %s943_s2 = inlined_call_operand.hbm [shape: f32[2,1,256], index: 2, kind: output, shape index: {}]  }
   0x1   :  { %9 = vsyncpa [#allocation3 + $0x1], 0 }
   0x2   :  { %10 = vsyncpa [#allocation6], 0 }
   0x3   :  { %12 = vsyncpa [#allocation6 + $0x1], 0 }
   0x4   :  { %13 = vsyncpa [#allocation4], 0 }
   0x5   :  { %15 = vsyncpa [#allocation4 + $0x1], 0  ;;  %s745_s9 = smov 0   ;;  %s747_s10 = smov 0  }
   0x6   :  { %s749_s11 = smov 0   ;;  %s751_s12 = smov 0  }
   0x7   :  { %s753_s13 = smov 0   ;;  %s755_s14 = smov 0  }
   0x8 LB: > { %s485_s15 = sadd.s32 4294967295, %s723_s14   ;;  %s486_s16 = sadd.s32 4294967294, %s723_s14   ;;  %s723_s14 = sphi %s755_s14, %s21_s14   ;;  %s719_s13 = sphi %s753_s13, %s957_s13   ;;  %s715_s12 = sphi %s751_s12, %s956_s12   ;;  %s711_s11 = sphi %s749_s11, %s955_s11   ;;  %s707_s10 = sphi %s747_s10, %s954_s10   ;;  %s703_s9 = sphi %s745_s9, %s953_s9  }
   0x9   : > { %s33_s17 = sadd.s32 1, %s719_s13  ;;  %s42_s18 = sadd.s32 1, %s711_s11 }
   0xa   : > { %p35_p0 = scmp.ge.s32.totalorder %s33_s17, 2  ;;  %p49_p1 = scmp.ne.s32.totalorder %s711_s11, %s707_s10 }
   0xb   : > { %p50_p2 = scmp.eq.s32.totalorder %s723_s14, 0  ;;  %p55_p3 = scmp.ne.s32.totalorder %s707_s10, %s703_s9 }
   0xc   : > { %s959_s17 = smov (%p35_p0, %s33_s17), 0  ;;  %p56_p5 = scmp.eq.s32.totalorder %s485_s15, 0 }
   0xd   : > { %p786_p4 = por %p50_p2, %p49_p1  ;;  %s37_s20 = ssub.s32 %s719_s13, %s959_s17 }
   0xe   : > { %p109_p6 = scmp.eq.s32.totalorder %s485_s15, 1  ;;  %p40_p7 = scmp.eq.s32.totalorder %s37_s20, 0 }
   0xf   : > { %p792_p8 = por %p56_p5, %p55_p3  ;;  %p115_p10 = scmp.eq.s32.totalorder %s486_s16, 1 }
  0x10   : > { %p796_p9 = por %p109_p6, %p49_p1  ;;  %p524_p13 = scmp.lt.s32.totalorder %s723_s14, 2 }
  0x11   : > { %s801_s23 = scalar_select %p40_p7, %s711_s11, %s42_s18  }
  0x12   : > { %p803_p11 = por %p115_p10, %p55_p3  ;;  %s810_s25 = sand.u32 1, %s711_s11  }
  0x13   : > { %s489_s26 = sshll.u32 %s810_s25, 3  ;;  %s504_s27 = sshll.u32 %s719_s13, 7 }
  0x14   : > { %s147_s30 = scalar_lea.hbm %s941_s0, %s504_s27  ;;  %s139_s3 = scalar_lea.vmem [#allocation2], %s489_s26 }
  0x15   : > { %s149_s4 = sshll.u32 %s139_s3, 4  ;;  %p819_p0 = pnand %p524_p13, %p786_p4  ;;  %s150_s4 = int_to_ptr.vmem [resolvable:$true] %s149_s4 }
  0x16   : > { %p495_p1 = scmp.ge.s32.totalorder %s723_s14, 1  ;;  %p175_p2 = scmp.lt.s32.totalorder %s723_s14, 3 }
  0x17   : > { %s136_s6 = scalar_lea.sflag [#allocation3], %s810_s25  ;;  %p585_p3 = pneg %p819_p0 }
  0x18   : > { %s596_s7 = scalar_lea.vmem %s150_s4, 128  ;;  %s725_s8 = smov [#allocation2]  }
  0x19   : > { %p597_p5 = scmp.ne.s32.totalorder %s150_s4, %s596_s7  ;;  %s601_s15 = sshll.u32 %s725_s8, 4  ;;  %s602_s15 = int_to_ptr.vmem [resolvable:$false] %s601_s15 }
  0x1a   : > { %s603_s16 = scalar_lea.vmem %s602_s15, 256  ;;  %p604_p4 = scmp.lt.s32.totalorder %s150_s4, %s602_s15 }
  0x1b   : > { %p599_p6 = pnand %p597_p5, %p585_p3  ;;  %p605_p10 = scmp.lt.s32.totalorder %s603_s16, %s596_s7 }
  0x1d   : > { %p600_p7 = pneg %p599_p6  ;;  %p606_p13 = por %p605_p10, %p604_p4 }
  0x1f   : > { %p607_p12 = pnand %p606_p13, %p600_p7 }
  0x21   : > { %610 = shalt.err (!%p607_p12)
}
  0x22   : > { %516 = dma.hbm_to_vmem [thread:$0]  (!%p819_p0), %s147_s30, 128, %s150_s4, %s136_s6  }
  0x23   : > { %p837_p5 = pnand %p495_p1, %p175_p2  ;;  %s492_s19 = sshll.u32 %s810_s25, 1 }
  0x24   : > { %s505_s20 = sshll.u32 %s719_s13, 5  ;;  %s160_s29 = scalar_lea.vmem [#allocation5], %s492_s19 }
  0x25   : > { %s168_s28 = scalar_lea.hbm %s942_s1, %s505_s20  ;;  %s170_s3 = sshll.u32 %s160_s29, 4  ;;  %s171_s3 = int_to_ptr.vmem [resolvable:$true] %s170_s3 }
  0x26   : > { %s157_s7 = scalar_lea.sflag [#allocation6], %s810_s25  ;;  %s624_s8 = scalar_lea.vmem %s171_s3, 32 }
  0x27   : > { %p625_p12 = scmp.ne.s32.totalorder %s171_s3, %s624_s8  ;;  %s726_s30 = smov [#allocation5]  }
  0x28   : > { %s629_s4 = sshll.u32 %s726_s30, 4  ;;  %s630_s4 = int_to_ptr.vmem [resolvable:$false] %s629_s4 }
  0x29   : > { %p627_p6 = pnand %p625_p12, %p585_p3  ;;  %s631_s6 = scalar_lea.vmem %s630_s4, 64 }
  0x2a   : > { %p632_p1 = scmp.lt.s32.totalorder %s171_s3, %s630_s4  ;;  %p633_p2 = scmp.lt.s32.totalorder %s631_s6, %s624_s8 }
  0x2b   : > { %p628_p7 = pneg %p627_p6 }
  0x2c   : > { %p634_p4 = por %p633_p2, %p632_p1 }
  0x2e   : > { %p635_p10 = pnand %p634_p4, %p628_p7 }
  0x30   : > { %638 = shalt.err (!%p635_p10)
}
  0x31   : > { %519 = dma.hbm_to_vmem [thread:$0]  (!%p819_p0), %s168_s28, 32, %s171_s3, %s157_s7  }
  0x32   : > { %179 = sbr.rel (%p837_p5) target bundleno = 148 (0x94), region = 28  ;;  %s855_s25 = sand.u32 (!%p837_p5), 1, %s707_s10  }
  0x33   : > { %s496_s15 = sshll.u32 (!%p837_p5), %s855_s25, 3  ;;  %s182_s16 = scalar_lea.sflag (!%p837_p5), [#allocation3], %s855_s25 }
  0x34   : > { %s185_s19 = scalar_lea.vmem (!%p837_p5), [#allocation2], %s496_s15 }
  0x37   : > { %690 = dma.done.wait (%p792_p8), %s182_s16, 128  }
  0x38   : > { %692 = vsyncadd (%p792_p8), %s182_s16, 4294967168  ;;  %s497_s5 = sshll.u32 %s855_s25, 1  ;;  %s191_s18 = scalar_lea.sflag [#allocation6], %s855_s25 }
  0x39   : > { %s194_s20 = scalar_lea.vmem [#allocation5], %s497_s5 }
  0x3a   : > { %694 = dma.done.wait (%p792_p8), %s191_s18, 32  }
  0x3b   : > { %696 = vsyncadd (%p792_p8), %s191_s18, 4294967264  ;;  %vm258_vm0 = vcmask 1043456   ;;  %v727_v0 = vmov 1966171168   ;;  %v241_v2 = vlaneseq  ;;  %v223_v3 = vld [vmem:[%s185_s19] sm:$0xff]  ;;  %v728_v14 = vmov 1  }
  0x3c   : > { %v239_v1 = vunpack.c.l.s4 %v727_v0  ;;  %v256_v4 = vcombine.high %v223_v3, %v223_v3  ;;  %v259_v5 = vsel %vm258_vm0, %v223_v3, -inf  ;;  %v237_v15 = vcombine.low %v728_v14, %v728_v14  ;;  %v224_v26 = vld [vmem:[%s194_s20] sm:$0x3]  ;;  %s219_s21 = scalar_lea.vmem [#allocation7], %s497_s5  ;;  %s506_s27 = sshll.u32 %s715_s12, 5 }
  0x3d   : > { %v260_v6 = vrot.slane %v259_v5, 4  ;;  %v242_v8 = vshrl.u32 %v241_v2, 7  ;;  %vm232_vm1 = vcmp.ne.s32.totalorder %v224_v26, 255  ;;  %s375_s26 = sshll.u32 %s219_s21, 4  ;;  %vm355_vm6 = vcmp.lt.s32.totalorder %v241_v2, 256  ;;  %s373_s3 = scalar_lea.hbm %s943_s2, %s506_s27  ;;  %s894_s26 = int_to_ptr.vmem [resolvable:$true] %s375_s26 }
  0x3e   : > { %v240_v7 = vunpack.c.0.s8 %v239_v1  ;;  %v266_v9 = vsel %vm258_vm0, %v256_v4, -inf  ;;  %s359_s7 = scalar_lea.sflag [#allocation4], %s855_s25  ;;  %s639_s8 = scalar_lea.vmem %s894_s26, 32 }
  0x3f   : > { %v261_v10 = vmax.f32 %v259_v5, %v260_v6  ;;  %v267_v11 = vrot.slane %v266_v9, 4  ;;  %v305_v31 = vsub.s32 0, %v242_v8  ;;  %v309_v33 = vsub.s32 1, %v242_v8  ;;  %p640_p8 = scmp.ne.s32.totalorder %s894_s26, %s639_s8  ;;  %s729_s12 = smov [#allocation7]  }
  0x40   : > { %v874_v16 = vsub.s32 %v240_v7, %v242_v8  ;;  %s643_s30 = sshll.u32 %s729_s12, 4  ;;  %s644_s30 = int_to_ptr.vmem [resolvable:$false] %s643_s30 }
  0x41   : > { %v262_v12 = vrot.slane %v261_v10, 2  ;;  %v268_v13 = vmax.f32 %v266_v9, %v267_v11  ;;  %p641_p0 = pnand %p640_p8, %p796_p9  ;;  %s645_s4 = scalar_lea.vmem %s644_s30, 64 }
  0x42   : > { %v244_v21 = vrot.slane %v237_v15, %v874_v16  ;;  %p646_p13 = scmp.lt.s32.totalorder %s894_s26, %s644_s30  ;;  %p647_p5 = scmp.lt.s32.totalorder %s645_s4, %s639_s8 }
  0x43   : > { %v263_v17 = vmax.f32 %v261_v10, %v262_v12  ;;  %v269_v18 = vrot.slane %v268_v13, 2  ;;  %p642_p3 = pneg %p641_p0 }
  0x44   : > { %v251_v25 = vrot.slane %v244_v21, %v874_v16  ;;  %p648_p12 = por %p647_p5, %p646_p13 }
  0x45   : > { %v264_v19 = vrot.slane %v263_v17, 1  ;;  %v270_v20 = vmax.f32 %v268_v13, %v269_v18 }
  0x46   : > { %vm252_vm2 = vcmp.ne.s32.totalorder %v251_v25, 0  ;;  %p649_p6 = pnand %p648_p12, %p642_p3 }
  0x47   : > { %v265_v22 = vmax.f32 %v263_v17, %v264_v19  ;;  %v271_v23 = vrot.slane %v270_v20, 1  ;;  %vm878_vm3 = vmand %vm232_vm1, %vm252_vm2 }
  0x48   : > { %v254_v32 = vsel %vm878_vm3, %v224_v26, 0 }
  0x49   : > { %v272_v24 = vmax.f32 %v270_v20, %v271_v23  ;;  %v306_v34 = vrot.slane %v254_v32, %v305_v31  ;;  %v310_v35 = vrot.slane %v254_v32, %v309_v33 }
  0x4b   : > { %v275_v27 = vcombine.low %v265_v22, %v272_v24  ;;  %vm311_vm4 = vcmp.eq.s32.totalorder %v242_v8, %v306_v34  ;;  %vm312_vm5 = vcmp.eq.s32.totalorder %v242_v8, %v310_v35 }
  0x4d   : > { %v277_v28 = vsub.f32 %v223_v3, %v275_v27 }
  0x4f   : > { %v278_v29 = vmul.f32 1.442695, %v277_v28  ;;  %v314_v36 = vcombine.high %v277_v28, %v277_v28  ;;  %v316_v38 = vsel %vm311_vm4, %v277_v28, 0.0 }
  0x50   : > { %v318_v44 = vsel %vm258_vm0, %v316_v38, 0.0 }
  0x51   : > { %577 = vpow2.f32 %v278_v29  ;;  %v317_v42 = vsel %vm312_vm5, %v314_v36, 0.0  ;;  %v319_v50 = vrot.slane %v318_v44, 4 }
  0x52   : > { %v325_v47 = vsel %vm258_vm0, %v317_v42, 0.0 }
  0x53   : > { %v326_v53 = vrot.slane %v325_v47, 4  ;;  %v320_v56 = vadd.f32 %v319_v50, %v318_v44 }
  0x55   : > { %v327_v59 = vadd.f32 %v326_v53, %v325_v47  ;;  %v321_v61 = vrot.slane %v320_v56, 2 }
  0x57   : > { %v328_v62 = vrot.slane %v327_v59, 2  ;;  %v322_v63 = vadd.f32 %v321_v61, %v320_v56 }
  0x59   : > { %v329_v0 = vadd.f32 %v328_v62, %v327_v59  ;;  %v323_v1 = vrot.slane %v322_v63, 1 }
  0x5b   : > { %v330_v3 = vrot.slane %v329_v0, 1  ;;  %v324_v4 = vadd.f32 %v323_v1, %v322_v63 }
  0x5d   : > { %v331_v7 = vadd.f32 %v330_v3, %v329_v0 }
  0x5e   : > { %v578_v37 = vpop.eup %577 }
  0x5f   : > { %v281_v39 = vcombine.high %v578_v37, %v578_v37  ;;  %v283_v40 = vsel %vm258_vm0, %v578_v37, 0.0 }
  0x60   : > { %v284_v41 = vrot.slane %v283_v40, 4 }
  0x61   : > { %v290_v43 = vsel %vm258_vm0, %v281_v39, 0.0 }
  0x62   : > { %v285_v45 = vadd.f32 %v284_v41, %v283_v40  ;;  %v291_v46 = vrot.slane %v290_v43, 4 }
  0x64   : > { %v286_v48 = vrot.slane %v285_v45, 2  ;;  %v292_v49 = vadd.f32 %v291_v46, %v290_v43 }
  0x66   : > { %v287_v51 = vadd.f32 %v286_v48, %v285_v45  ;;  %v293_v52 = vrot.slane %v292_v49, 2 }
  0x68   : > { %v288_v54 = vrot.slane %v287_v51, 1  ;;  %v294_v55 = vadd.f32 %v293_v52, %v292_v49 }
  0x6a   : > { %v289_v57 = vadd.f32 %v288_v54, %v287_v51  ;;  %v295_v58 = vrot.slane %v294_v55, 1 }
  0x6c   : > { %v296_v60 = vadd.f32 %v295_v58, %v294_v55  ;;  %579 = vlog2.f32 %v289_v57 }
  0x6e   : > { %581 = vlog2.f32 %v296_v60 }
  0x79   : > { %v580_v5 = vpop.eup %579 }
  0x7a   : > { %v298_v6 = vmul.f32 0.6931472, %v580_v5 }
  0x7b   : > { %v582_v8 = vpop.eup %581 }
  0x7c   : > { %v300_v9 = vmul.f32 0.6931472, %v582_v8  ;;  %v332_v10 = vsub.f32 %v298_v6, %v324_v4 }
  0x7e   : > { %v333_v11 = vsub.f32 %v300_v9, %v331_v7 }
  0x80   : > { %v336_v12 = vcombine.low %v332_v10, %v333_v11 }
  0x82   : > { %v343_v13 = vrot.slane %v336_v12, %v874_v16 }
  0x84   : > { %v350_v14 = vrot.slane %v343_v13, %v874_v16 }
  0x86   : > { %v352_v15 = vsel %vm878_vm3, %v350_v14, 0.0 }
  0x87   : > { %357 = vst.msk [vmem:[%s219_s21] sm:$0x3] %vm355_vm6, %v352_v15 }
  0x88   : > { %652 = shalt.err (!%p649_p6)
}
  0x89   : > { %s653_s6 = scalar_lea.hbm %s373_s3, 32  ;;  %s657_s16 = scalar_lea.hbm %s943_s2, 64 }
  0x8a   : > { %p654_p7 = scmp.ne.s32.totalorder %s373_s3, %s653_s6  ;;  %p658_p4 = scmp.lt.s32.totalorder %s373_s3, %s943_s2 }
  0x8b   : > { %p659_p10 = scmp.lt.s32.totalorder %s657_s16, %s653_s6 }
  0x8c   : > { %p655_p1 = pnand %p654_p7, %p796_p9 }
  0x8d   : > { %p660_p8 = por %p659_p10, %p658_p4 }
  0x8e   : > { %p656_p2 = pneg %p655_p1 }
  0x90   : > { %p661_p0 = pnand %p660_p8, %p656_p2 }
  0x92   : > { %664 = shalt.err (!%p661_p0)
}
  0x93   : > { %511 = dma.vmem_to_hbm [thread:$0]  (%p796_p9), %s894_s26, 32, %s373_s3, %s359_s7  }
  0x94 PF: > { %s387_s18 = sand.u32 1, %s703_s9   ;;  %p952_p3 = scmp.ge.s32.totalorder %s723_s14, 2 }
  0x95   : > { %s388_s20 = scalar_lea.sflag [#allocation4], %s387_s18 }
  0x96   : > { %p521_p13 = pnand %p952_p3, %p803_p11 }
  0x98   : > { %p522_p5 = pneg %p521_p13 }
  0x9a   : > { %698 = dma.done.wait (%p522_p5), %s388_s20, 32  }
  0x9b   : > { %700 = vsyncadd (%p522_p5), %s388_s20, 4294967264  ;;  %s21_s14 = sadd.s32 1, %s723_s14   ;;  %s953_s9 = smov %s707_s10 }
  0x9c   : > { %p18_p12 = scmp.ge.s32.totalorder %s21_s14, 4   ;;  %s954_s10 = smov %s711_s11 }
  0x9d   : > { %s955_s11 = smov %s801_s23  ;;  %s956_s12 = smov %s719_s13 }
  0x9e   : > { %s957_s13 = smov %s959_s17  ;;  %20 = sbr.rel (!%p18_p12) target bundleno = 8 (0x8), region = 86 }
  0xa3   :  { %393 = vsyncpa [#allocation3], 1 }
  0xa4   :  { %395 = vsyncpa [#allocation3 + $0x1], 1 }
  0xa5   :  { %396 = vsyncpa [#allocation6], 1 }
  0xa6   :  { %398 = vsyncpa [#allocation6 + $0x1], 1 }
  0xa7   :  { %399 = vsyncpa [#allocation4], 1 }
  0xa8   :  { %401 = vsyncpa [#allocation4 + $0x1], 1 }

</bundles_post_ra>
